<compile_context>
chip_gen: v7x
topology: tpu7x:2x2x1
jax: 0.10.0
libtpu: 0.0.40
codegen_flags: <defaults>
</compile_context>

<pallas_src>
import jax
import jax.numpy as jnp
from jax.experimental import pallas as pl
from jax.experimental.pallas import tpu as pltpu


# ---------------------------------------------------------------------------
# in-kernel helpers
# ---------------------------------------------------------------------------
def _hardsigmoid(x):
    # PyTorch nn.Hardsigmoid: relu6(x + 3) / 6
    return jnp.clip(x + 3.0, 0.0, 6.0) * (1.0 / 6.0)


# ---------------------------------------------------------------------------
# fused SE kernel: one grid step = one batch element
# ---------------------------------------------------------------------------
def se_fused_kernel(x_ref, w1_ref, b1_ref, w2_ref, b2_ref, o_ref):
    """Global avg pool -> FC -> ReLU -> FC -> Hardsigmoid -> channel re-scale.

    x_ref / o_ref : (1, C, H*W)   (lane-dense: H*W on the 128-lane axis)
    w1_ref        : (C, C//4),  b1_ref: (1, C//4)
    w2_ref        : (C//4, C),  b2_ref: (1, C)
    """
    xv = x_ref[...]                                   # (1, C, HW)
    hw = xv.shape[-1]                                 # static
    # AdaptiveAvgPool2d(1) + flatten  ->  (1, C)
    pooled = jnp.sum(xv, axis=-1) * (1.0 / hw)
    # linear1 + ReLU
    h = jnp.dot(pooled, w1_ref[...],
                preferred_element_type=jnp.float32) + b1_ref[...]
    h = jnp.maximum(h, 0.0)
    # linear2 + Hardsigmoid
    s = jnp.dot(h, w2_ref[...],
                preferred_element_type=jnp.float32) + b2_ref[...]
    s = _hardsigmoid(s)                               # (1, C)
    # identity * scale  (broadcast over the lane-dense spatial axis)
    o_ref[...] = (xv * s[:, :, None]).astype(o_ref.dtype)


# ---------------------------------------------------------------------------
# wrapper
# ---------------------------------------------------------------------------
def squeeze_excitation_block(x_nchw, w1, b1, w2, b2):
    """Forward pass of SqueezeExitationBlock. Input/output layout: NCHW.

    w1: (C, C//4), b1: (1, C//4), w2: (C//4, C), b2: (1, C)
    (PyTorch nn.Linear stores weight as (out, in); pass W.T here.)
    """
    N, C, H, W = x_nchw.shape
    HW = H * W
    C4 = w1.shape[1]
    x3 = x_nchw.reshape(N, C, HW)                     # contiguous view, no copy

    out3 = pl.pallas_call(
        se_fused_kernel,
        out_shape=jax.ShapeDtypeStruct((N, C, HW), x_nchw.dtype),
        grid_spec=pl.GridSpec(
            grid=(N,),
            in_specs=[
                pl.BlockSpec((1, C, HW), lambda n: (n, 0, 0)),
                pl.BlockSpec((C, C4), lambda n: (0, 0)),
                pl.BlockSpec((1, C4), lambda n: (0, 0)),
                pl.BlockSpec((C4, C), lambda n: (0, 0)),
                pl.BlockSpec((1, C), lambda n: (0, 0)),
            ],
            out_specs=pl.BlockSpec((1, C, HW), lambda n: (n, 0, 0)),
        ),
        compiler_params=pltpu.CompilerParams(
            dimension_semantics=("parallel",)),       # v7x: shard N over 2 TCs
    )(x3, w1, b1, w2, b2)
    return out3.reshape(N, C, H, W)


# ---------------------------------------------------------------------------
# pure-JAX reference (for correctness check)
# ---------------------------------------------------------------------------
def se_reference(x, w1, b1, w2, b2):
    pooled = jnp.mean(x, axis=(2, 3))                        # (N, C)
    h = jnp.maximum(pooled @ w1 + b1, 0.0)                   # (N, C//4)
    s = jnp.clip(h @ w2 + b2 + 3.0, 0.0, 6.0) / 6.0          # (N, C)
    return x * s[:, :, None, None]


# ---------------------------------------------------------------------------
if __name__ == "__main__":
    # SqueezeExitationBlock(in_channels=16) on a (2, 16, 16, 16) NCHW input.
    N, C, H, W = 2, 16, 16, 16
    C4 = C // 4

    key = jax.random.PRNGKey(0)
    kx, k1, k2, k3, k4 = jax.random.split(key, 5)
    x = jax.random.normal(kx, (N, C, H, W), jnp.float32)     # NCHW, like PyTorch
    # matmul-ready (in, out) weights; equivalent to torch Linear weight.T
    w1 = jax.random.normal(k1, (C, C4), jnp.float32) * 0.3
    b1 = 0.1 * jax.random.normal(k2, (C4,), jnp.float32)
    w2 = jax.random.normal(k3, (C4, C), jnp.float32) * 0.3
    b2 = 0.1 * jax.random.normal(k4, (C,), jnp.float32)

    out = squeeze_excitation_block(x, w1, b1[None, :], w2, b2[None, :])
    out = jax.block_until_ready(out)

    ref = se_reference(x, w1, b1, w2, b2)
    assert out.shape == (N, C, H, W)
    assert jnp.all(jnp.isfinite(out))
    assert jnp.allclose(out, ref, atol=1e-5, rtol=1e-5)
    print("KERNEL_OK")
</pallas_src>

<mosaic_0001>
module attributes {stable_mosaic.version = 11 : i64} {
  func.func @se_fused_kernel(%arg0: i32, %arg1: memref<1x16x256xf32, #tpu.memory_space<vmem>>, %arg2: memref<16x4xf32, #tpu.memory_space<vmem>>, %arg3: memref<1x4xf32, #tpu.memory_space<vmem>>, %arg4: memref<4x16xf32, #tpu.memory_space<vmem>>, %arg5: memref<1x16xf32, #tpu.memory_space<vmem>>, %arg6: memref<1x16x256xf32, #tpu.memory_space<vmem>>) attributes {dimension_semantics = [#tpu.dimension_semantics<parallel>], iteration_bounds = array<i64: 2>, scalar_prefetch = 0 : i64, scratch_operands = 0 : i64, tpu.core_type = #tpu.core_type<tc>, window_params = [{transform_indices = @transform_0, window_bounds = array<i64: 1, 16, 256>}, {pipeline_mode = #tpu.pipeline_mode<synchronous>, transform_indices = @transform_1, window_bounds = array<i64: 16, 4>}, {pipeline_mode = #tpu.pipeline_mode<synchronous>, transform_indices = @transform_2, window_bounds = array<i64: 1, 4>}, {pipeline_mode = #tpu.pipeline_mode<synchronous>, transform_indices = @transform_3, window_bounds = array<i64: 4, 16>}, {pipeline_mode = #tpu.pipeline_mode<synchronous>, transform_indices = @transform_4, window_bounds = array<i64: 1, 16>}, {transform_indices = @transform_5, window_bounds = array<i64: 1, 16, 256>}]} {
    %c0 = arith.constant 0 : index
    %c0_0 = arith.constant 0 : index
    %c0_1 = arith.constant 0 : index
    %0 = vector.load %arg1[%c0, %c0_0, %c0_1] : memref<1x16x256xf32, #tpu.memory_space<vmem>>, vector<1x16x256xf32>
    %cst = arith.constant dense<0.000000e+00> : vector<1x16xf32>
    %1 = vector.multi_reduction <add>, %0, %cst [2] : vector<1x16x256xf32> to vector<1x16xf32>
    %cst_2 = arith.constant 3.906250e-03 : f32
    %2 = vector.broadcast %cst_2 : f32 to vector<1x16xf32>
    %3 = arith.mulf %1, %2 : vector<1x16xf32>
    %c0_3 = arith.constant 0 : index
    %c0_4 = arith.constant 0 : index
    %4 = vector.load %arg2[%c0_3, %c0_4] : memref<16x4xf32, #tpu.memory_space<vmem>>, vector<16x4xf32>
    %cst_5 = arith.constant dense<0.000000e+00> : vector<1x4xf32>
    %5 = tpu.matmul %3, %4, %cst_5 {dimension_numbers = #tpu.dot_dimension_numbers<[1], [0], [0], [1], [0, 0, 1, 1], [], []>} : vector<1x16xf32>, vector<16x4xf32>, vector<1x4xf32> -> vector<1x4xf32>
    %c0_6 = arith.constant 0 : index
    %c0_7 = arith.constant 0 : index
    %6 = vector.load %arg3[%c0_6, %c0_7] : memref<1x4xf32, #tpu.memory_space<vmem>>, vector<1x4xf32>
    %7 = arith.addf %5, %6 : vector<1x4xf32>
    %cst_8 = arith.constant 0.000000e+00 : f32
    %8 = vector.broadcast %cst_8 : f32 to vector<1x4xf32>
    %9 = arith.maximumf %7, %8 : vector<1x4xf32>
    %c0_9 = arith.constant 0 : index
    %c0_10 = arith.constant 0 : index
    %10 = vector.load %arg4[%c0_9, %c0_10] : memref<4x16xf32, #tpu.memory_space<vmem>>, vector<4x16xf32>
    %cst_11 = arith.constant dense<0.000000e+00> : vector<1x16xf32>
    %11 = tpu.matmul %9, %10, %cst_11 {dimension_numbers = #tpu.dot_dimension_numbers<[1], [0], [0], [1], [0, 0, 1, 1], [], []>} : vector<1x4xf32>, vector<4x16xf32>, vector<1x16xf32> -> vector<1x16xf32>
    %c0_12 = arith.constant 0 : index
    %c0_13 = arith.constant 0 : index
    %12 = vector.load %arg5[%c0_12, %c0_13] : memref<1x16xf32, #tpu.memory_space<vmem>>, vector<1x16xf32>
    %13 = arith.addf %11, %12 : vector<1x16xf32>
    %cst_14 = arith.constant 3.000000e+00 : f32
    %14 = vector.broadcast %cst_14 : f32 to vector<1x16xf32>
    %15 = arith.addf %13, %14 : vector<1x16xf32>
    %cst_15 = arith.constant 0.000000e+00 : f32
    %cst_16 = arith.constant 6.000000e+00 : f32
    %16 = vector.broadcast %cst_15 : f32 to vector<1x16xf32>
    %17 = arith.maximumf %16, %15 : vector<1x16xf32>
    %18 = vector.broadcast %cst_16 : f32 to vector<1x16xf32>
    %19 = arith.minimumf %18, %17 : vector<1x16xf32>
    %cst_17 = arith.constant 0.166666672 : f32
    %20 = vector.broadcast %cst_17 : f32 to vector<1x16xf32>
    %21 = arith.mulf %19, %20 : vector<1x16xf32>
    %22 = vector.shape_cast %21 : vector<1x16xf32> to vector<1x16x1xf32>
    %23 = vector.broadcast %22 : vector<1x16x1xf32> to vector<1x16x256xf32>
    %24 = arith.mulf %0, %23 : vector<1x16x256xf32>
    %c0_18 = arith.constant 0 : index
    %c0_19 = arith.constant 0 : index
    %c0_20 = arith.constant 0 : index
    %25 = vector.load %arg6[%c0_18, %c0_19, %c0_20] : memref<1x16x256xf32, #tpu.memory_space<vmem>>, vector<1x16x256xf32>
    tpu.vector_store %arg6[%c0_18, %c0_19, %c0_20], %24 {strides = array<i32>} : memref<1x16x256xf32, #tpu.memory_space<vmem>>, vector<1x16x256xf32>,
    return
  }
  func.func @transform_0(%arg0: i32) -> (i32, i32, i32) {
    %c0_i32 = arith.constant 0 : i32
    %c0_i32_0 = arith.constant 0 : i32
    %c0_i32_1 = arith.constant 0 : i32
    return %arg0, %c0_i32, %c0_i32_0 : i32, i32, i32
  }
  func.func @transform_1(%arg0: i32) -> (i32, i32) {
    %c0_i32 = arith.constant 0 : i32
    %c0_i32_0 = arith.constant 0 : i32
    %c0_i32_1 = arith.constant 0 : i32
    return %c0_i32, %c0_i32_0 : i32, i32
  }
  func.func @transform_2(%arg0: i32) -> (i32, i32) {
    %c0_i32 = arith.constant 0 : i32
    %c0_i32_0 = arith.constant 0 : i32
    %c0_i32_1 = arith.constant 0 : i32
    return %c0_i32, %c0_i32_0 : i32, i32
  }
  func.func @transform_3(%arg0: i32) -> (i32, i32) {
    %c0_i32 = arith.constant 0 : i32
    %c0_i32_0 = arith.constant 0 : i32
    %c0_i32_1 = arith.constant 0 : i32
    return %c0_i32, %c0_i32_0 : i32, i32
  }
  func.func @transform_4(%arg0: i32) -> (i32, i32) {
    %c0_i32 = arith.constant 0 : i32
    %c0_i32_0 = arith.constant 0 : i32
    %c0_i32_1 = arith.constant 0 : i32
    return %c0_i32, %c0_i32_0 : i32, i32
  }
  func.func @transform_5(%arg0: i32) -> (i32, i32, i32) {
    %c0_i32 = arith.constant 0 : i32
    %c0_i32_0 = arith.constant 0 : i32
    %c0_i32_1 = arith.constant 0 : i32
    return %arg0, %c0_i32, %c0_i32_0 : i32, i32, i32
  }
}

</mosaic_0001>

<bundles_post_ra>
// kernel: tpu_custom_call.1
= control target key start
LH: loop header
LB: loop body
LE: loop exit
PB: predicated region body
PF: predicated region fallthrough
CT: control target
= control target key end

     0   :  { %10 = vsyncpa [#allocation3], 0  ;;  %s955_s0 = inlined_call_operand.hbm [shape: f32[2,16,256], index: 0, kind: input, shape index: {}]   ;;  %s956_s1 = inlined_call_operand.vmem [shape: f32[16,4], index: 1, kind: input, shape index: {}]   ;;  %s957_s2 = inlined_call_operand.vmem [shape: f32[1,4], index: 2, kind: input, shape index: {}]   ;;  %s958_s3 = inlined_call_operand.vmem [shape: f32[4,16], index: 3, kind: input, shape index: {}]   ;;  %s959_s4 = inlined_call_operand.vmem [shape: f32[1,16], index: 4, kind: input, shape index: {}]   ;;  %s960_s5 = inlined_call_operand.hbm [shape: f32[2,16,256], index: 5, kind: output, shape index: {}]  }
   0x1   :  { %12 = vsyncpa [#allocation3 + $0x1], 0 }
   0x2   :  { %13 = vsyncpa [#allocation4], 0 }
   0x3   :  { %15 = vsyncpa [#allocation4 + $0x1], 0  ;;  %s766_s18 = smov 0   ;;  %s768_s19 = smov 0  }
   0x4   :  { %s770_s20 = smov 0   ;;  %s772_s21 = smov 0  }
   0x5 LB: > { %s787_s22 = sadd.s32 4294967295, %s725_s21   ;;  %s537_s23 = sadd.s32 4294967294, %s725_s21   ;;  %s725_s21 = sphi %s772_s21, %s973_s21   ;;  %s721_s20 = sphi %s770_s20, %s972_s20   ;;  %s717_s19 = sphi %s768_s19, %s971_s19   ;;  %s713_s18 = sphi %s766_s18, %s970_s18  }
   0x6   : > { %s791_s24 = sadd.s32 1, %s725_s21   ;;  %s28_s25 = sadd.s32 1, %s721_s20 }
   0x7   : > { %s25_s26 = ssub.s32 %s725_s21, %s791_s24  ;;  %p35_p0 = scmp.ne.s32.totalorder %s721_s20, %s717_s19 }
   0x8   : > { %p26_p1 = scmp.eq.s32.totalorder %s25_s26, 0  ;;  %p36_p2 = scmp.eq.s32.totalorder %s725_s21, 0 }
   0x9   : > { %p41_p3 = scmp.ne.s32.totalorder %s717_s19, %s713_s18  ;;  %p42_p4 = scmp.eq.s32.totalorder %s787_s22, 0 }
   0xa   : > { %s803_s27 = scalar_select %p26_p1, %s721_s20, %s28_s25  }
   0xb   : > { %p805_p5 = por %p36_p2, %p35_p0  ;;  %p809_p6 = por %p42_p4, %p41_p3 }
   0xc   : > { %p149_p7 = scmp.eq.s32.totalorder %s787_s22, 1  ;;  %p155_p8 = scmp.eq.s32.totalorder %s537_s23, 1 }
   0xd   : > { %p588_p10 = scmp.lt.s32.totalorder %s725_s21, 2  ;;  %s187_s7 = sand.u32 1, %s721_s20  }
   0xe   : > { %p816_p11 = por %p149_p7, %p35_p0  ;;  %p820_p12 = por %p155_p8, %p41_p3 }
   0xf   : > { %s554_s8 = sshll.u32 %s725_s21, 9  ;;  %s540_s9 = sshll.u32 %s187_s7, 5 }
  0x10   : > { %s964_s30 = scalar_select %p816_p11, 1, 0 }
  0x11   : > { %s965_s6 = scalar_select %p820_p12, 1, 0 }
  0x12   : > { %s829_s12 = scalar_lea.hbm %s955_s0, %s554_s8  ;;  %s191_s13 = scalar_lea.vmem [#allocation2], %s540_s9 }
  0x13   : > { %s198_s14 = sshll.u32 %s191_s13, 4  ;;  %p833_p13 = pnand %p588_p10, %p805_p5  ;;  %s837_s14 = int_to_ptr.vmem [resolvable:$true] %s198_s14 }
  0x14   : > { %s839_s16 = scalar_lea.sflag [#allocation3], %s187_s7  ;;  %s629_s17 = scalar_lea.hbm %s829_s12, 512 }
  0x15   : > { %p630_p0 = scmp.ne.s32.totalorder %s829_s12, %s629_s17  ;;  %p631_p1 = pneg %p833_p13 }
  0x16   : > { %s634_s26 = scalar_lea.hbm %s955_s0, 1024  ;;  %p635_p4 = scmp.lt.u32.totalorder %s829_s12, %s955_s0 }
  0x17   : > { %p632_p2 = pnand %p631_p1, %p630_p0  ;;  %p636_p5 = scmp.lt.u32.totalorder %s634_s26, %s629_s17 }
  0x18   : > { %p638_p8 = scmp.lt.u32.totalorder %s629_s17, %s829_s12 }
  0x19   : > { %p633_p3 = pneg %p632_p2  ;;  %p637_p7 = por %p636_p5, %p635_p4 }
  0x1b   : > { %p639_p10 = por %p638_p8, %p637_p7 }
  0x1d   : > { %p640_p9 = pnand %p639_p10, %p633_p3 }
  0x1f   : > { %643 = shalt.err (!%p640_p9)
}
  0x20   : > { %s644_s7 = scalar_lea.vmem %s837_s14, 512  ;;  %s727_s9 = smov [#allocation2]  }
  0x21   : > { %p645_p0 = scmp.ne.s32.totalorder %s837_s14, %s644_s7  ;;  %s649_s10 = sshll.u32 %s727_s9, 4  ;;  %s650_s10 = int_to_ptr.vmem [resolvable:$false] %s649_s10 }
  0x22   : > { %s651_s11 = scalar_lea.vmem %s650_s10, 1024  ;;  %p652_p11 = scmp.lt.s32.totalorder %s837_s14, %s650_s10 }
  0x23   : > { %p647_p2 = pnand %p645_p0, %p631_p1  ;;  %p653_p4 = scmp.lt.s32.totalorder %s651_s11, %s644_s7 }
  0x25   : > { %p648_p12 = pneg %p647_p2  ;;  %p654_p5 = por %p653_p4, %p652_p11 }
  0x27   : > { %p655_p7 = pnand %p654_p5, %p648_p12 }
  0x29   : > { %658 = shalt.err (!%p655_p7)
}
  0x2a   : > { %s728_s13 = smov 256   ;;  %s729_s17 = smov 16  }
  0x2b   : > { %583 = dma.hbm_to_vmem [thread:$0]  (!%p833_p13), %s829_s12, 512, %s837_s14, %s839_s16, %s728_s13, %s728_s13, %s729_s17  }
  0x2c   : > { %p543_p9 = scmp.ge.s32.totalorder %s725_s21, 1  ;;  %p206_p1 = scmp.lt.s32.totalorder %s725_s21, 3 }
  0x2e   : > { %p207_p3 = pnand %p543_p9, %p206_p1 }
  0x2f   : > { %s870_s23 = sand.u32 (!%p207_p3), 1, %s717_s19  }
  0x30   : > { %210 = sbr.rel (%p207_p3) target bundleno = 786 (0x312), region = 40  ;;  %s544_s25 = sshll.u32 (!%p207_p3), %s870_s23, 5 }
  0x31   : > { %s213_s26 = scalar_lea.sflag (!%p207_p3), [#allocation3], %s870_s23  ;;  %s216_s28 = scalar_lea.vmem (!%p207_p3), [#allocation2], %s544_s25 }
  0x37   : > { %704 = dma.done.wait (%p809_p6), %s213_s26, 512  }
  0x38   : > { %706 = vsyncadd (%p809_p6), %s213_s26, 4294966784  ;;  %v243_v0 = vld [vmem:[%s216_s28] sm:$0xff]  ;;  %v244_v1 = vld [vmem:[%s216_s28 + $0x8] sm:$0xff]  ;;  %v730_v9 = vmov 0.0|0.0   ;;  %vm731_vm0 = vmmov 0   ;;  %v732_v10 = vmov 0.0   ;;  %v260_v11 = vlaneseq }
  0x39   : > { %v880_v2 = vld [vmem:[%s216_s28 + $0x10] sm:$0xff]  ;;  %v247_v3 = vadd.f32 %v244_v1, %v243_v0  ;;  %v882_v4 = vld [vmem:[%s216_s28 + $0x18] sm:$0xff]  ;;  %v255_v6 = vld [vmem:[%s956_s1] sm:$0xff]  ;;  %573 = vmatprep.subr.bf16.mxu0 %v730_v9  ;;  %565 = vmatprep.mubr.msk.f32.mxu0 %vm731_vm0, %v732_v10  ;;  %vm271_vm1 = vcmask 130112   ;;  %vm273_vm2 = vcmask 130048   ;;  %vm353_vm3 = vcmask 1043456  }
  0x3a   : > { %v250_v5 = vadd.f32 %v882_v4, %v880_v2  ;;  %v256_v7 = vld [vmem:[%s956_s1 + $0x8] sm:$0xff]  ;;  %568 = vmatprep.subr.mxu1 %v732_v10  ;;  %570 = vmatprep.mubr.msk.f32.mxu1 %vm731_vm0, %v732_v10  ;;  %v261_v12 = vand.u32 127, %v260_v11  ;;  %v263_v13 = vshrl.u32 %v260_v11, 7  ;;  %v347_v24 = vld [vmem:[%s958_s3] sm:$0xf]  ;;  %vm349_vm4 = vcmask 31744  }
  0x3b   : > { %248 = vadd.xlane.f32.xlu0 %v247_v3  ;;  %v574_v8 = vpack.c.bf16 %v256_v7, %v255_v6  ;;  %569 = vmatpush3.msk.msra.mxu1 %vm353_vm3, %v347_v24  ;;  %v257_v25 = vld [vmem:[%s957_s2] sm:$0x1]  ;;  %s242_s13 = scalar_lea.vmem [#allocation5], %s544_s25  ;;  %s555_s26 = sshll.u32 %s787_s22, 9 }
  0x3c   : > { %v266_v14 = vadd.s32 4294967288, %v261_v12  ;;  %v264_v16 = vsub.s32 %v261_v12, %v263_v13  ;;  %v348_v30 = vld [vmem:[%s959_s4] sm:$0x1]  ;;  %v433_v37 = vsub.s32 0, %v263_v13  ;;  %s464_s17 = sshll.u32 %s242_s13, 4  ;;  %s909_s14 = scalar_lea.hbm %s960_s5, %s555_s26  ;;  %s904_s17 = int_to_ptr.vmem [resolvable:$true] %s464_s17 }
  0x3d   : > { %575 = vmatpush3.bf16.msra.mxu0 %v574_v8  ;;  %s451_s22 = scalar_lea.sflag [#allocation4], %s870_s23  ;;  %s659_s25 = scalar_lea.vmem %s904_s17, 512 }
  0x3e   : > { %v269_v18 = vsub.s32 %v266_v14, %v263_v13  ;;  %p660_p6 = scmp.ne.s32.totalorder %s904_s17, %s659_s25  ;;  %p967_p11 = scmp.ne.s32.totalorder %s964_s30, 0 }
  0x3f   : > { %251 = vadd.xlane.f32.xlu0 %v250_v5  ;;  %s733_s15 = smov [#allocation5]  }
  0x40   : > { %p661_p12 = pnand %p660_p6, %p967_p11  ;;  %s663_s16 = sshll.u32 %s733_s15, 4  ;;  %s664_s16 = int_to_ptr.vmem [resolvable:$false] %s663_s16 }
  0x41   : > { %s665_s29 = scalar_lea.vmem %s664_s16, 1024  ;;  %p666_p8 = scmp.lt.s32.totalorder %s904_s17, %s664_s16 }
  0x42   : > { %p662_p13 = pneg %p661_p12  ;;  %p667_p10 = scmp.lt.s32.totalorder %s665_s29, %s659_s25 }
  0x44   : > { %p668_p0 = por %p667_p10, %p666_p8 }
  0x46   : > { %p669_p2 = pnand %p668_p0, %p662_p13 }
  0xc8   : > { %v249_v15 = vpop.xlane.xlu0 %248 }
  0xc9   : > { %v253_v17 = vmul.f32 0.00390625, %v249_v15 }
  0xcb   : > { %v265_v21 = vrot.slane %v253_v17, %v264_v16 }
  0xcc   : > { %v252_v19 = vpop.xlane.xlu0 %251 }
  0xcd   : > { %v254_v20 = vmul.f32 0.00390625, %v252_v19 }
  0xcf   : > { %v270_v22 = vrot.slane %v254_v20, %v269_v18 }
  0xd1   : > { %v272_v23 = vsel %vm271_vm1, %v270_v22, %v265_v21 }
  0xd2   : > { %566 = vmatmul.mubr.msk.f32.vlgmr.msra.gmra.mrb[0].mxu0 %vm273_vm2, %v272_v23 }
 0x1a5   : > { %v342_v26 = vpop.f32.mrb[0].mxu0 }
 0x1a6   : > { %v343_v27 = vadd.f32 %v342_v26, %v257_v25  ;;  %v567_v28 = vpop.f32.mrb[1].mxu0 }
 0x1a8   : > { %v346_v29 = vmax.f32 %v343_v27, 0.0 }
 0x1aa   : > { %571 = vmatmul.mubr.msk.f32.vlgmr.msra.gmra.mrb[0].mxu1 %vm349_vm4, %v346_v29 }
 0x27d   : > { %v423_v31 = vpop.f32.mrb[0].mxu1 }
 0x27e   : > { %v424_v32 = vadd.f32 %v423_v31, %v348_v30  ;;  %v572_v33 = vpop.f32.mrb[1].mxu1 }
 0x280   : > { %v427_v34 = vadd.f32 3.0, %v424_v32 }
 0x282   : > { %v428_v35 = vmax.f32 %v427_v34, 0.0 }
 0x284   : > { %v429_v36 = vmin.f32 %v428_v35, 6.0 }
 0x286   : > { %v430_v38 = vmul.f32 0.16666667, %v429_v36 }
 0x288   : > { %v434_v39 = vrot.slane %v430_v38, %v433_v37 }
 0x28a   : > { %436 = vbcast.lane.b32.xlu1 %v434_v39, 256 }
 0x28e   : > { %440 = vbcast.lane.b32.xlu1 %v434_v39, 264 }
 0x2fc   : > { %v437_v40 = vpop.permute.xlu1 %436 }
 0x2fd   : > { %v442_v41 = vmul.f32 %v437_v40, %v243_v0  ;;  %v443_v42 = vmul.f32 %v437_v40, %v244_v1 }
 0x2ff   : > { %446 = vst [vmem:[%s242_s13] sm:$0xff] %v442_v41  ;;  %447 = vst [vmem:[%s242_s13 + $0x8] sm:$0xff] %v443_v42 }
 0x300   : > { %v441_v43 = vpop.permute.xlu1 %440 }
 0x301   : > { %v444_v44 = vmul.f32 %v441_v43, %v880_v2  ;;  %v445_v45 = vmul.f32 %v441_v43, %v882_v4 }
 0x303   : > { %448 = vst [vmem:[%s242_s13 + $0x10] sm:$0xff] %v444_v44  ;;  %449 = vst [vmem:[%s242_s13 + $0x18] sm:$0xff] %v445_v45 }
 0x304   : > { %672 = shalt.err (!%p669_p2)
}
 0x305   : > { %s673_s8 = scalar_lea.hbm %s909_s14, 512  ;;  %s677_s10 = scalar_lea.hbm %s960_s5, 1024 }
 0x306   : > { %p674_p4 = scmp.ne.s32.totalorder %s909_s14, %s673_s8  ;;  %p678_p9 = scmp.lt.u32.totalorder %s909_s14, %s960_s5 }
 0x307   : > { %p679_p1 = scmp.lt.u32.totalorder %s677_s10, %s673_s8  ;;  %p681_p6 = scmp.lt.u32.totalorder %s673_s8, %s909_s14 }
 0x308   : > { %p675_p5 = pnand %p674_p4, %p967_p11 }
 0x309   : > { %p680_p3 = por %p679_p1, %p678_p9 }
 0x30a   : > { %p676_p7 = pneg %p675_p5 }
 0x30b   : > { %p682_p12 = por %p681_p6, %p680_p3 }
 0x30d   : > { %p683_p13 = pnand %p682_p12, %p676_p7 }
 0x30f   : > { %686 = shalt.err (!%p683_p13)
}
 0x310   : > { %s734_s26 = smov 256   ;;  %s735_s28 = smov 16  }
 0x311   : > { %578 = dma.vmem_to_hbm [thread:$0]  (%p967_p11), %s904_s17, 512, %s909_s14, %s451_s22, %s734_s26, %s734_s26, %s735_s28  }
 0x312 PF: > { %s479_s12 = sand.u32 1, %s713_s18   ;;  %p968_p8 = scmp.ne.s32.totalorder %s965_s6, 0 }
 0x313   : > { %p969_p10 = scmp.ge.s32.totalorder %s725_s21, 2  ;;  %s480_s25 = scalar_lea.sflag [#allocation4], %s479_s12 }
 0x315   : > { %p585_p0 = pnand %p969_p10, %p968_p8 }
 0x317   : > { %708 = dma.done.wait (!%p585_p0), %s480_s25, 512  }
 0x318   : > { %710 = vsyncadd (!%p585_p0), %s480_s25, 4294966784  ;;  %p18_p2 = scmp.ge.s32.totalorder %s791_s24, 4   ;;  %s970_s18 = smov %s717_s19 }
 0x319   : > { %s971_s19 = smov %s721_s20  ;;  %s972_s20 = smov %s803_s27 }
 0x31a   : > { %s973_s21 = smov %s791_s24  ;;  %20 = sbr.rel (!%p18_p2) target bundleno = 5 (0x5), region = 85 }
 0x321   :  { %485 = vsyncpa [#allocation3], 1 }
 0x322   :  { %487 = vsyncpa [#allocation3 + $0x1], 1 }
 0x323   :  { %488 = vsyncpa [#allocation4], 1 }
 0x324   :  { %490 = vsyncpa [#allocation4 + $0x1], 1 }

</bundles_post_ra>
